<compile_context>
chip_gen: v5e
topology: v5e:2x2
jax: 0.10.0
libtpu: 0.0.40
codegen_flags: <defaults>
</compile_context>

<pallas_src>
import functools

import jax
import jax.numpy as jnp
from jax.experimental import pallas as pl
from jax.experimental.pallas import tpu as pltpu


def _rand_mask_kernel(u_t_ref, u_s_ref, mask_ref, m_out_ref, *, p, temporal_p):
    """Compute out_mask = NOT(temporal AND spatial) * mask, broadcast over C.

    u_t_ref : (1, T*V) f32  temporal uniforms (already broadcast over V)
    u_s_ref : (1, T*V) f32  spatial uniforms
    mask_ref, m_out_ref : (C, T*V) in x.dtype
    """
    drop = jnp.logical_and(
        u_t_ref[...] < jnp.float32(temporal_p),   # temporal_mask[t]
        u_s_ref[...] < jnp.float32(p),            # spatial_mask[t, v]
    )                                             # (1, T*V) bool
    keep = jnp.logical_not(drop).astype(m_out_ref.dtype)   # (1, T*V)
    # broadcast over C (sublane axis) and apply the incoming validity mask
    m_out_ref[...] = keep * mask_ref[...]


def random_mask_keypoint(x, mask, key, p, temporal_p=1.0):
    """Pallas implementation of RandomMaskKeypoint.forward.

    Args:
      x:    (C, T, V) array.
      mask: array broadcast-compatible with x.
      key:  jax PRNG key (vary per call, like torch's global RNG stream).
      p, temporal_p: drop probabilities (compile-time constants).

    Returns:
      (x, out_mask) with out_mask.shape == x.shape, dtype of x.
    """
    C, T, V = x.shape
    mask_full = jnp.broadcast_to(mask, x.shape).astype(x.dtype)

    # torch.rand(T) / torch.rand(T, V) equivalents, drawn outside the kernel.
    kt, ks = jax.random.split(key)
    u_t = jax.random.uniform(kt, (T,), dtype=jnp.float32)
    u_s = jax.random.uniform(ks, (T, V), dtype=jnp.float32)

    # Lane-dense layout: flatten (T, V) -> T*V on the 128-lane axis.
    tv = T * V
    u_t_flat = jnp.broadcast_to(u_t[:, None], (T, V)).reshape(1, tv)
    u_s_flat = u_s.reshape(1, tv)
    mask_flat = mask_full.reshape(C, tv)

    kernel = functools.partial(
        _rand_mask_kernel, p=float(p), temporal_p=float(temporal_p)
    )
    m_out = pl.pallas_call(
        kernel,
        out_shape=jax.ShapeDtypeStruct((C, tv), x.dtype),
        in_specs=[
            pl.BlockSpec(memory_space=pltpu.MemorySpace.VMEM),   # u_t
            pl.BlockSpec(memory_space=pltpu.MemorySpace.VMEM),   # u_s
            pl.BlockSpec(memory_space=pltpu.MemorySpace.VMEM),   # mask
        ],
        out_specs=pl.BlockSpec(memory_space=pltpu.MemorySpace.VMEM),
    )(u_t_flat, u_s_flat, mask_flat)

    # x passes through untouched -> no HBM round trip for it.
    return x, m_out.reshape(C, T, V)


if __name__ == "__main__":
    # Small shapes consistent with the module: C channels, T frames, V joints.
    C, T, V = 3, 16, 25
    p, temporal_p = 0.3, 0.9

    key = jax.random.PRNGKey(0)
    kx, km, kr = jax.random.split(key, 3)
    x = jax.random.normal(kx, (C, T, V), dtype=jnp.float32)
    # incoming validity mask (e.g. 1.0 where the keypoint exists)
    mask = (jax.random.uniform(km, (C, T, V)) > 0.1).astype(jnp.float32)

    x_out, out_mask = random_mask_keypoint(
        x, mask, kr, p=p, temporal_p=temporal_p
    )
    jax.block_until_ready((x_out, out_mask))

    # Sanity checks on semantics (not a bitwise RNG match, which is impossible
    # across frameworks): x passes through unchanged, and the output mask is
    # elementwise either 0 or the original mask value.
    assert x_out.shape == (C, T, V) and out_mask.shape == (C, T, V)
    assert out_mask.dtype == x.dtype
    assert bool(jnp.all(x_out == x))
    ok = jnp.logical_or(out_mask == 0.0, out_mask == mask)
    assert bool(jnp.all(ok))

    # Drop pattern must be shared across channels (broadcast over C): a given
    # (t, v) cannot be definitely-dropped in one channel and kept in another.
    dropped = jnp.logical_and(out_mask == 0.0, mask != 0.0)   # definite drop
    kept = out_mask != 0.0                                    # definite keep
    conflict = jnp.logical_and(jnp.any(dropped, axis=0), jnp.any(kept, axis=0))
    assert not bool(jnp.any(conflict))

    print("KERNEL_OK")
</pallas_src>

<mosaic_0001>
module attributes {stable_mosaic.version = 11 : i64} {
  func.func @_rand_mask_kernel(%arg0: memref<1x400xf32, #tpu.memory_space<vmem>>, %arg1: memref<1x400xf32, #tpu.memory_space<vmem>>, %arg2: memref<3x400xf32, #tpu.memory_space<vmem>>, %arg3: memref<3x400xf32, #tpu.memory_space<vmem>>) attributes {dimension_semantics = [], scalar_prefetch = 0 : i64, scratch_operands = 0 : i64, tpu.core_type = #tpu.core_type<tc>} {
    %c0 = arith.constant 0 : index
    %c0_0 = arith.constant 0 : index
    %0 = vector.load %arg0[%c0, %c0_0] : memref<1x400xf32, #tpu.memory_space<vmem>>, vector<1x400xf32>
    %cst = arith.constant 0.899999976 : f32
    %1 = vector.broadcast %cst : f32 to vector<1x400xf32>
    %2 = arith.cmpf olt, %0, %1 : vector<1x400xf32>
    %c0_1 = arith.constant 0 : index
    %c0_2 = arith.constant 0 : index
    %3 = vector.load %arg1[%c0_1, %c0_2] : memref<1x400xf32, #tpu.memory_space<vmem>>, vector<1x400xf32>
    %cst_3 = arith.constant 3.000000e-01 : f32
    %4 = vector.broadcast %cst_3 : f32 to vector<1x400xf32>
    %5 = arith.cmpf olt, %3, %4 : vector<1x400xf32>
    %6 = arith.andi %2, %5 : vector<1x400xi1>
    %cst_4 = arith.constant dense<true> : vector<1x400xi1>
    %7 = arith.xori %6, %cst_4 : vector<1x400xi1>
    %8 = arith.extui %7 : vector<1x400xi1> to vector<1x400xi32>
    %9 = arith.sitofp %8 : vector<1x400xi32> to vector<1x400xf32>
    %c0_5 = arith.constant 0 : index
    %c0_6 = arith.constant 0 : index
    %10 = vector.load %arg2[%c0_5, %c0_6] : memref<3x400xf32, #tpu.memory_space<vmem>>, vector<3x400xf32>
    %11 = vector.broadcast %9 : vector<1x400xf32> to vector<3x400xf32>
    %12 = arith.mulf %11, %10 : vector<3x400xf32>
    %c0_7 = arith.constant 0 : index
    %c0_8 = arith.constant 0 : index
    %13 = vector.load %arg3[%c0_7, %c0_8] : memref<3x400xf32, #tpu.memory_space<vmem>>, vector<3x400xf32>
    tpu.vector_store %arg3[%c0_7, %c0_8], %12 {strides = array<i32>} : memref<3x400xf32, #tpu.memory_space<vmem>>, vector<3x400xf32>,
    return
  }
}

</mosaic_0001>

<bundles_post_ra>
// kernel: tpu_custom_call.1
= control target key start
LH: loop header
LB: loop body
LE: loop exit
PB: predicated region body
PF: predicated region fallthrough
CT: control target
= control target key end

     0   :  { %8 = vsyncpa [#allocation3], 0  ;;  %s275_s0 = inlined_call_operand.hbm [shape: f32[1,400], index: 0, kind: input, shape index: {}]   ;;  %s276_s1 = inlined_call_operand.hbm [shape: f32[1,400], index: 1, kind: input, shape index: {}]   ;;  %s277_s2 = inlined_call_operand.hbm [shape: f32[3,400], index: 2, kind: input, shape index: {}]   ;;  %s278_s3 = inlined_call_operand.hbm [shape: f32[3,400], index: 3, kind: output, shape index: {}]  }
   0x1   :  { %9 = vsyncpa [#allocation6], 0  ;;  %s27_s14 = sshll.u32 %s276_s1, 4  ;;  %s28_s14 = int_to_ptr.hbm [resolvable:$true] %s27_s14 }
   0x2   :  { %10 = vsyncpa [#allocation4], 0  ;;  %s235_s15 = smov [#allocation5]   ;;  %s16_s19 = sshll.u32 %s275_s0, 4  ;;  %s17_s19 = int_to_ptr.hbm [resolvable:$true] %s16_s19 }
   0x3   :  { %s29_s16 = sshll.u32 %s235_s15, 4  ;;  %s236_s20 = smov [#allocation2]   ;;  %s30_s16 = int_to_ptr.vmem [resolvable:$true] %s29_s16 }
   0x4   :  { %32 = dma.hbm_to_vmem [thread:$0]  %s28_s14, 64, %s30_s16, [#allocation6]  }
   0x5   :  { %s18_s21 = sshll.u32 %s236_s20, 4  ;;  %s38_s24 = sshll.u32 %s277_s2, 4  ;;  %s19_s21 = int_to_ptr.vmem [resolvable:$true] %s18_s21  ;;  %s39_s24 = int_to_ptr.hbm [resolvable:$true] %s38_s24 }
   0x6   :  { %21 = dma.hbm_to_vmem [thread:$0]  %s17_s19, 64, %s19_s21, [#allocation3]  }
   0x7   :  { %s237_s1 = smov [#allocation7]  }
   0x8   :  { %s40_s25 = sshll.u32 %s237_s1, 4  ;;  %s41_s25 = int_to_ptr.vmem [resolvable:$true] %s40_s25 }
   0x9   :  { %43 = dma.hbm_to_vmem [thread:$0]  %s39_s24, 256, %s41_s25, [#allocation6]  }
   0xa   :  { %229 = dma.done.wait [#allocation3], 64  }
   0xb   :  { %230 = vsyncadd [#allocation3], 4294967232 }
   0xc   :  { %231 = dma.done.wait [#allocation6], 320  }
   0xd   :  { %232 = vsyncadd [#allocation6], 4294966976  ;;  %v64_v0 = vld [vmem:[#allocation7] sm:$0x77]  ;;  %v65_v1 = vld [vmem:[#allocation7 + $0x8] sm:$0x77] }
   0xe   :  { %v56_v2 = vld [vmem:[#allocation2] sm:$0xf]  ;;  %77 = vst [vmem:[#allocation1] ss:$2 sm:$0xff] %v64_v0  ;;  %v58_v3 = vld [vmem:[#allocation5] sm:$0xf] }
   0xf   :  { %vm57_vm0 = vcmp.lt.f32.partialorder %v56_v2, 0.9  ;;  %79 = vst [vmem:[#allocation1 + $0x10] ss:$2 sm:$0xff] %v65_v1  ;;  %vm59_vm1 = vcmp.lt.f32.partialorder %v58_v3, 0.3 }
  0x10   :  { %vm60_vm2 = vmand %vm57_vm0, %vm59_vm1  ;;  %vm238_vm3 = vmmov 1   ;;  %v239_v4 = vmov 0.0   ;;  %vm104_vm5 = vcmask 1042432   ;;  %vm105_vm6 = vcmask 129028   ;;  %s240_s0 = smov [#allocation8]   ;;  %s115_s28 = sshll.u32 %s278_s3, 4  ;;  %s116_s28 = int_to_ptr.hbm [resolvable:$true] %s115_s28 }
  0x11   :  { %vm61_vm4 = vmxor %vm60_vm2, %vm238_vm3  ;;  %vm98_vm7 = vcmask 1043456   ;;  %s113_s2 = sshll.u32 %s240_s0, 4  ;;  %s114_s2 = int_to_ptr.vmem [resolvable:$true] %s113_s2 }
  0x12   :  { %v126_v5 = vsel %vm61_vm4, 1.0, %v239_v4  ;;  %vm106_vm8 = vmor %vm105_vm6, %vm104_vm5 }
  0x13   :  { %v68_v6 = vperm.slane %v126_v5, 1  ;;  %v70_v7 = vperm.slane %v126_v5, 3  ;;  %v67_v8 = vperm.slane %v126_v5, 0  ;;  %v69_v9 = vperm.slane %v126_v5, 2 }
  0x15   :  { %v80_v10 = vld.sshfl [vmem:[#allocation1] sm:$0xff pattern:$0x75316420]  ;;  %v81_v11 = vld.sshfl [vmem:[#allocation1 + $0x8] sm:$0xff pattern:$0x75316420] }
  0x16   :  { %v89_v12 = vmul.f32 %v81_v11, %v68_v6  ;;  %v82_v13 = vld.sshfl [vmem:[#allocation1 + $0x10] sm:$0xff pattern:$0x75316420]  ;;  %v83_v14 = vld.sshfl [vmem:[#allocation1 + $0x18] sm:$0xff pattern:$0x75316420]  ;;  %v88_v16 = vmul.f32 %v80_v10, %v67_v8 }
  0x17   :  { %v91_v15 = vmul.f32 %v83_v14, %v70_v7  ;;  %v90_v18 = vmul.f32 %v82_v13, %v69_v9 }
  0x18   :  { %v96_v17 = vrot.slane %v89_v12, 4 }
  0x19   :  { %v97_v19 = vrot.slane %v91_v15, 4 }
  0x1a   :  { %v99_v20 = vsel %vm98_vm7, %v88_v16, %v96_v17 }
  0x1b   :  { %103 = vst [vmem:[#allocation8] sm:$0x77] %v99_v20  ;;  %v100_v21 = vsel %vm98_vm7, %v90_v18, %v97_v19 }
  0x1c   :  { %107 = vst.msk [vmem:[#allocation8 + $0x8] sm:$0x77] %vm106_vm8, %v100_v21 }
  0x1d   :  { %118 = dma.vmem_to_hbm [thread:$0]  %s114_s2, 256, %s116_s28, [#allocation4]  }
  0x1e   :  { %233 = dma.done.wait [#allocation4], 256  }
  0x1f   :  { %234 = vsyncadd [#allocation4], 4294967040 }
  0x20   :  { %123 = vsyncpa [#allocation3], 1 }
  0x21   :  { %124 = vsyncpa [#allocation6], 1 }
  0x22   :  { %125 = vsyncpa [#allocation4], 1 }

</bundles_post_ra>
